<compile_context>
chip_gen: v7x
topology: tpu7x:2x2x1
jax: 0.10.0
libtpu: 0.0.40
codegen_flags: <defaults>
</compile_context>

<pallas_src>
import functools
import math

import jax
import jax.numpy as jnp
from jax.experimental import pallas as pl
from jax.experimental.pallas import tpu as pltpu


def _flash_attn_kernel(q_ref, k_ref, v_ref, o_ref, m_sc, l_sc, acc_sc, *,
                       scale, compute_dtype):
    # Block shapes: q (1, tl, E), k (1, ts, E), v (1, ts, D), o (1, tl, D).
    si = pl.program_id(2)

    @pl.when(si == 0)
    def _init():
        m_sc[...] = jnp.full_like(m_sc, -jnp.inf)
        l_sc[...] = jnp.zeros_like(l_sc)
        acc_sc[...] = jnp.zeros_like(acc_sc)

    # Fold the softmax scale into Q (tl*E multiplies per step instead of a
    # tl*ts multiply on the score matrix), then cast the MXU operands.
    q = (q_ref[0] * scale).astype(compute_dtype)     # (tl, E)
    k = k_ref[0].astype(compute_dtype)               # (ts, E)
    v = v_ref[0].astype(compute_dtype)               # (ts, D)

    # scores = (scale*q) @ k^T ; contract on E of both operands (no k.T copy).
    s = jax.lax.dot_general(
        q, k,
        dimension_numbers=(((1,), (1,)), ((), ())),
        preferred_element_type=jnp.float32)           # (tl, ts) f32

    m_prev = m_sc[...]                                 # (tl, 1)
    m_new = jnp.maximum(m_prev, jnp.max(s, axis=-1, keepdims=True))
    alpha = jnp.exp(m_prev - m_new)                    # (tl, 1)
    p = jnp.exp(s - m_new)                             # (tl, ts) f32

    l_sc[...] = alpha * l_sc[...] + jnp.sum(p, axis=-1, keepdims=True)
    acc_sc[...] = alpha * acc_sc[...] + jax.lax.dot_general(
        p.astype(compute_dtype), v,
        dimension_numbers=(((1,), (0,)), ((), ())),
        preferred_element_type=jnp.float32)            # (tl, D) f32
    m_sc[...] = m_new

    @pl.when(si == pl.num_programs(2) - 1)
    def _finalize():
        # Exact divide, once per L tile: no measurable cost, no approx error.
        o_ref[0] = (acc_sc[...] / l_sc[...]).astype(o_ref.dtype)


def _pick_tile(extent, target):
    """Largest multiple-of-8 divisor of `extent` that is <= target.

    Falls back to the full extent (which always satisfies the (8,128) block
    constraint as an exact-dim block) when no such divisor exists.
    """
    if extent <= target:
        return extent
    t = (min(target, extent) // 8) * 8
    while t >= 8:
        if extent % t == 0:
            return t
        t -= 8
    return extent


def _vmem_bytes(tl, ts, E, D, itemsize):
    """Rough VMEM footprint: double-buffered I/O blocks + scratch + f32 temps."""
    blocks = 2 * (tl * E + ts * E + ts * D + tl * D) * itemsize
    scratch = (2 * tl + tl * D) * 4
    interm = 3 * tl * ts * 4          # s, p, p-cast live copies (f32)
    return blocks + scratch + interm


# Conservative budget so the enlarged tiles fit v7x's 64 MiB physical VMEM
# with headroom; v5e/v6e (128 MiB) trivially satisfy it as well.
_VMEM_BUDGET = 48 * 1024 * 1024
_VMEM_LIMIT = 56 * 1024 * 1024


def full_attention(queries, keys, values, attn_mask=None, scale=None,
                   *, block_l=512, block_s=None, mxu_dtype=None):
    """queries: (B, L, H, E), keys: (B, S, H, E), values: (B, S, H, D).

    Returns (V, None) with V: (B, L, H, D), matching FullAttention_ori.forward
    (mask_flag=False, output_attention=False, eval-mode dropout).

    mxu_dtype: optional dtype (e.g. jnp.bfloat16) for the MXU operands; the
    softmax math and the accumulator always stay in f32.  Default: exact path
    in the input dtype.
    """
    B, L, H, E = queries.shape
    _, S, _, D = values.shape
    scale = float(scale) if scale is not None else 1.0 / math.sqrt(E)
    itemsize = jnp.dtype(queries.dtype).itemsize
    compute_dtype = jnp.dtype(mxu_dtype) if mxu_dtype is not None else queries.dtype

    # --- tile selection -----------------------------------------------------
    tl = _pick_tile(L, block_l)

    if block_s is None:
        # Prefer K/V resident across the whole S axis (loaded once per head).
        if _vmem_bytes(tl, S, E, D, itemsize) <= _VMEM_BUDGET:
            ts = S
        else:
            ts = _pick_tile(S, 128)   # fallback if nothing larger fits
            for cand in (2048, 1024, 512, 256):
                t = _pick_tile(S, cand)
                if _vmem_bytes(tl, t, E, D, itemsize) <= _VMEM_BUDGET:
                    ts = t
                    break
    else:
        ts = _pick_tile(S, block_s)

    # --- layout glue (head-major, B*H collapsed into one fat parallel axis) --
    q = jnp.transpose(queries, (0, 2, 1, 3)).reshape(B * H, L, E)
    k = jnp.transpose(keys, (0, 2, 1, 3)).reshape(B * H, S, E)
    v = jnp.transpose(values, (0, 2, 1, 3)).reshape(B * H, S, D)

    grid = (B * H, L // tl, S // ts)

    # When ts < S the K/V tensors are re-streamed once per L tile.
    kv_reload = (L // tl) if ts < S else 1
    cost = pl.CostEstimate(
        flops=int(2 * B * H * L * S * (E + D)),
        transcendentals=int(B * H * L * S),
        bytes_accessed=int((q.size + (k.size + v.size) * kv_reload
                            + B * H * L * D) * itemsize),
    )

    out = pl.pallas_call(
        functools.partial(_flash_attn_kernel, scale=scale,
                          compute_dtype=compute_dtype),
        out_shape=jax.ShapeDtypeStruct((B * H, L, D), queries.dtype),
        grid_spec=pltpu.PrefetchScalarGridSpec(
            num_scalar_prefetch=0,
            grid=grid,
            in_specs=[
                pl.BlockSpec((1, tl, E), lambda bh, li, si: (bh, li, 0)),
                # With ts == S the block index below is constant across li, so
                # K/V stay resident in VMEM and are DMA'd once per head.
                pl.BlockSpec((1, ts, E), lambda bh, li, si: (bh, si, 0)),
                pl.BlockSpec((1, ts, D), lambda bh, li, si: (bh, si, 0)),
            ],
            out_specs=pl.BlockSpec((1, tl, D), lambda bh, li, si: (bh, li, 0)),
            scratch_shapes=[
                pltpu.VMEM((tl, 1), jnp.float32),   # running max m
                pltpu.VMEM((tl, 1), jnp.float32),   # running denom l
                pltpu.VMEM((tl, D), jnp.float32),   # output accumulator
            ],
        ),
        compiler_params=pltpu.CompilerParams(
            dimension_semantics=("parallel", "parallel", "arbitrary"),
            vmem_limit_bytes=_VMEM_LIMIT,
        ),
        cost_estimate=cost,
    )(q, k, v)

    V = jnp.transpose(out.reshape(B, H, L, D), (0, 2, 1, 3))   # (B, L, H, D)
    return V, None


def _reference(queries, keys, values, scale=None):
    """Pure-JAX reference mirroring the PyTorch forward (eval mode)."""
    B, L, H, E = queries.shape
    scale = scale if scale is not None else 1.0 / math.sqrt(E)
    scores = jnp.einsum('blhe,bshe->bhls', queries, keys)
    A = jax.nn.softmax(scale * scores, axis=-1)
    return jnp.einsum('bhls,bshd->blhd', A, values)


if __name__ == "__main__":
    B, L, S, H, E, D = 2, 8, 8, 4, 32, 32
    key = jax.random.PRNGKey(0)
    kq, kk, kv = jax.random.split(key, 3)
    queries = jax.random.normal(kq, (B, L, H, E), dtype=jnp.float32)
    keys = jax.random.normal(kk, (B, S, H, E), dtype=jnp.float32)
    values = jax.random.normal(kv, (B, S, H, D), dtype=jnp.float32)

    V, attn = full_attention(queries, keys, values)
    V = jax.block_until_ready(V)

    V_ref = _reference(queries, keys, values)
    assert V.shape == (B, L, H, D), V.shape
    assert attn is None
    err = float(jnp.max(jnp.abs(V - V_ref)))
    assert err < 2e-3, err

    print("KERNEL_OK")
</pallas_src>

<mosaic_0001>
module attributes {stable_mosaic.version = 11 : i64} {
  func.func @_flash_attn_kernel(%arg0: i32, %arg1: i32, %arg2: i32, %arg3: memref<1x8x32xf32, #tpu.memory_space<vmem>>, %arg4: memref<1x8x32xf32, #tpu.memory_space<vmem>>, %arg5: memref<1x8x32xf32, #tpu.memory_space<vmem>>, %arg6: memref<1x8x32xf32, #tpu.memory_space<vmem>>, %arg7: memref<8x1xf32, #tpu.memory_space<vmem>>, %arg8: memref<8x1xf32, #tpu.memory_space<vmem>>, %arg9: memref<8x32xf32, #tpu.memory_space<vmem>>) attributes {dimension_semantics = [#tpu.dimension_semantics<parallel>, #tpu.dimension_semantics<parallel>, #tpu.dimension_semantics<arbitrary>], iteration_bounds = array<i64: 8, 1, 1>, scalar_prefetch = 0 : i64, scratch_operands = 3 : i64, tpu.core_type = #tpu.core_type<tc>, window_params = [{transform_indices = @transform_0, window_bounds = array<i64: 1, 8, 32>}, {transform_indices = @transform_1, window_bounds = array<i64: 1, 8, 32>}, {transform_indices = @transform_2, window_bounds = array<i64: 1, 8, 32>}, {transform_indices = @transform_3, window_bounds = array<i64: 1, 8, 32>}]} {
    %c0_i32 = arith.constant 0 : i32
    %0 = arith.cmpi eq, %arg2, %c0_i32 : i32
    %1 = arith.extui %0 : i1 to i32
    %c0_i32_0 = arith.constant 0 : i32
    %2 = arith.cmpi ne, %1, %c0_i32_0 : i32
    scf.if %2 {
      %cst_27 = arith.constant 0xFF800000 : f32
      %37 = vector.broadcast %cst_27 : f32 to vector<8x1xf32>
      %c0_28 = arith.constant 0 : index
      %c0_29 = arith.constant 0 : index
      %38 = vector.load %arg7[%c0_28, %c0_29] : memref<8x1xf32, #tpu.memory_space<vmem>>, vector<8x1xf32>
      tpu.vector_store %arg7[%c0_28, %c0_29], %37 {strides = array<i32>} : memref<8x1xf32, #tpu.memory_space<vmem>>, vector<8x1xf32>,
      %cst_30 = arith.constant 0.000000e+00 : f32
      %39 = vector.broadcast %cst_30 : f32 to vector<8x1xf32>
      %c0_31 = arith.constant 0 : index
      %c0_32 = arith.constant 0 : index
      %40 = vector.load %arg8[%c0_31, %c0_32] : memref<8x1xf32, #tpu.memory_space<vmem>>, vector<8x1xf32>
      tpu.vector_store %arg8[%c0_31, %c0_32], %39 {strides = array<i32>} : memref<8x1xf32, #tpu.memory_space<vmem>>, vector<8x1xf32>,
      %cst_33 = arith.constant 0.000000e+00 : f32
      %41 = vector.broadcast %cst_33 : f32 to vector<8x32xf32>
      %c0_34 = arith.constant 0 : index
      %c0_35 = arith.constant 0 : index
      %42 = vector.load %arg9[%c0_34, %c0_35] : memref<8x32xf32, #tpu.memory_space<vmem>>, vector<8x32xf32>
      tpu.vector_store %arg9[%c0_34, %c0_35], %41 {strides = array<i32>} : memref<8x32xf32, #tpu.memory_space<vmem>>, vector<8x32xf32>,
    } else {
    }
    %c0 = arith.constant 0 : index
    %c0_1 = arith.constant 0 : index
    %c0_2 = arith.constant 0 : index
    %3 = vector.load %arg3[%c0, %c0_1, %c0_2] : memref<1x8x32xf32, #tpu.memory_space<vmem>>, vector<1x8x32xf32>
    %4 = vector.shape_cast %3 : vector<1x8x32xf32> to vector<8x32xf32>
    %cst = arith.constant 0.176776692 : f32
    %5 = vector.broadcast %cst : f32 to vector<8x32xf32>
    %6 = arith.mulf %4, %5 : vector<8x32xf32>
    %c0_3 = arith.constant 0 : index
    %c0_4 = arith.constant 0 : index
    %c0_5 = arith.constant 0 : index
    %7 = vector.load %arg4[%c0_3, %c0_4, %c0_5] : memref<1x8x32xf32, #tpu.memory_space<vmem>>, vector<1x8x32xf32>
    %8 = vector.shape_cast %7 : vector<1x8x32xf32> to vector<8x32xf32>
    %c0_6 = arith.constant 0 : index
    %c0_7 = arith.constant 0 : index
    %c0_8 = arith.constant 0 : index
    %9 = vector.load %arg5[%c0_6, %c0_7, %c0_8] : memref<1x8x32xf32, #tpu.memory_space<vmem>>, vector<1x8x32xf32>
    %10 = vector.shape_cast %9 : vector<1x8x32xf32> to vector<8x32xf32>
    %cst_9 = arith.constant dense<0.000000e+00> : vector<8x8xf32>
    %11 = tpu.matmul %6, %8, %cst_9 {dimension_numbers = #tpu.dot_dimension_numbers<[1], [1], [0], [0], [0, 0, 1, 0], [], []>} : vector<8x32xf32>, vector<8x32xf32>, vector<8x8xf32> -> vector<8x8xf32>
    %c0_10 = arith.constant 0 : index
    %c0_11 = arith.constant 0 : index
    %12 = vector.load %arg7[%c0_10, %c0_11] : memref<8x1xf32, #tpu.memory_space<vmem>>, vector<8x1xf32>
    %cst_12 = arith.constant dense<0xFF800000> : vector<8xf32>
    %13 = vector.multi_reduction <maximumf>, %11, %cst_12 [1] : vector<8x8xf32> to vector<8xf32>
    %14 = vector.shape_cast %13 : vector<8xf32> to vector<8x1xf32>
    %15 = arith.maximumf %12, %14 : vector<8x1xf32>
    %16 = arith.subf %12, %15 : vector<8x1xf32>
    %17 = math.exp %16 : vector<8x1xf32>
    %18 = vector.broadcast %15 : vector<8x1xf32> to vector<8x8xf32>
    %19 = arith.subf %11, %18 : vector<8x8xf32>
    %20 = math.exp %19 : vector<8x8xf32>
    %c0_13 = arith.constant 0 : index
    %c0_14 = arith.constant 0 : index
    %21 = vector.load %arg8[%c0_13, %c0_14] : memref<8x1xf32, #tpu.memory_space<vmem>>, vector<8x1xf32>
    %22 = arith.mulf %17, %21 : vector<8x1xf32>
    %cst_15 = arith.constant dense<0.000000e+00> : vector<8xf32>
    %23 = vector.multi_reduction <add>, %20, %cst_15 [1] : vector<8x8xf32> to vector<8xf32>
    %24 = vector.shape_cast %23 : vector<8xf32> to vector<8x1xf32>
    %25 = arith.addf %22, %24 : vector<8x1xf32>
    %c0_16 = arith.constant 0 : index
    %c0_17 = arith.constant 0 : index
    %26 = vector.load %arg8[%c0_16, %c0_17] : memref<8x1xf32, #tpu.memory_space<vmem>>, vector<8x1xf32>
    tpu.vector_store %arg8[%c0_16, %c0_17], %25 {strides = array<i32>} : memref<8x1xf32, #tpu.memory_space<vmem>>, vector<8x1xf32>,
    %c0_18 = arith.constant 0 : index
    %c0_19 = arith.constant 0 : index
    %27 = vector.load %arg9[%c0_18, %c0_19] : memref<8x32xf32, #tpu.memory_space<vmem>>, vector<8x32xf32>
    %28 = vector.broadcast %17 : vector<8x1xf32> to vector<8x32xf32>
    %29 = arith.mulf %28, %27 : vector<8x32xf32>
    %cst_20 = arith.constant dense<0.000000e+00> : vector<8x32xf32>
    %30 = tpu.matmul %20, %10, %cst_20 {dimension_numbers = #tpu.dot_dimension_numbers<[1], [0], [0], [1], [0, 0, 1, 1], [], []>} : vector<8x8xf32>, vector<8x32xf32>, vector<8x32xf32> -> vector<8x32xf32>
    %31 = arith.addf %29, %30 : vector<8x32xf32>
    %c0_21 = arith.constant 0 : index
    %c0_22 = arith.constant 0 : index
    %32 = vector.load %arg9[%c0_21, %c0_22] : memref<8x32xf32, #tpu.memory_space<vmem>>, vector<8x32xf32>
    tpu.vector_store %arg9[%c0_21, %c0_22], %31 {strides = array<i32>} : memref<8x32xf32, #tpu.memory_space<vmem>>, vector<8x32xf32>,
    %c0_23 = arith.constant 0 : index
    %c0_24 = arith.constant 0 : index
    %33 = vector.load %arg7[%c0_23, %c0_24] : memref<8x1xf32, #tpu.memory_space<vmem>>, vector<8x1xf32>
    tpu.vector_store %arg7[%c0_23, %c0_24], %15 {strides = array<i32>} : memref<8x1xf32, #tpu.memory_space<vmem>>, vector<8x1xf32>,
    %c0_i32_25 = arith.constant 0 : i32
    %34 = arith.cmpi eq, %arg2, %c0_i32_25 : i32
    %35 = arith.extui %34 : i1 to i32
    %c0_i32_26 = arith.constant 0 : i32
    %36 = arith.cmpi ne, %35, %c0_i32_26 : i32
    scf.if %36 {
      %c0_27 = arith.constant 0 : index
      %c0_28 = arith.constant 0 : index
      %37 = vector.load %arg9[%c0_27, %c0_28] : memref<8x32xf32, #tpu.memory_space<vmem>>, vector<8x32xf32>
      %c0_29 = arith.constant 0 : index
      %c0_30 = arith.constant 0 : index
      %38 = vector.load %arg8[%c0_29, %c0_30] : memref<8x1xf32, #tpu.memory_space<vmem>>, vector<8x1xf32>
      %39 = vector.broadcast %38 : vector<8x1xf32> to vector<8x32xf32>
      %40 = arith.divf %37, %39 : vector<8x32xf32>
      %c0_31 = arith.constant 0 : index
      %c0_32 = arith.constant 0 : index
      %c0_33 = arith.constant 0 : index
      %41 = vector.load %arg6[%c0_31, %c0_32, %c0_33] : memref<1x8x32xf32, #tpu.memory_space<vmem>>, vector<1x8x32xf32>
      %42 = vector.shape_cast %41 : vector<1x8x32xf32> to vector<8x32xf32>
      %43 = vector.shape_cast %40 : vector<8x32xf32> to vector<1x8x32xf32>
      tpu.vector_store %arg6[%c0_31, %c0_32, %c0_33], %43 {strides = array<i32>} : memref<1x8x32xf32, #tpu.memory_space<vmem>>, vector<1x8x32xf32>,
    } else {
    }
    return
  }
  func.func @transform_0(%arg0: i32, %arg1: i32, %arg2: i32) -> (i32, i32, i32) {
    %c0_i32 = arith.constant 0 : i32
    %c0_i32_0 = arith.constant 0 : i32
    return %arg0, %arg1, %c0_i32 : i32, i32, i32
  }
  func.func @transform_1(%arg0: i32, %arg1: i32, %arg2: i32) -> (i32, i32, i32) {
    %c0_i32 = arith.constant 0 : i32
    %c0_i32_0 = arith.constant 0 : i32
    return %arg0, %arg2, %c0_i32 : i32, i32, i32
  }
  func.func @transform_2(%arg0: i32, %arg1: i32, %arg2: i32) -> (i32, i32, i32) {
    %c0_i32 = arith.constant 0 : i32
    %c0_i32_0 = arith.constant 0 : i32
    return %arg0, %arg2, %c0_i32 : i32, i32, i32
  }
  func.func @transform_3(%arg0: i32, %arg1: i32, %arg2: i32) -> (i32, i32, i32) {
    %c0_i32 = arith.constant 0 : i32
    %c0_i32_0 = arith.constant 0 : i32
    return %arg0, %arg1, %c0_i32 : i32, i32, i32
  }
}

</mosaic_0001>

<bundles_post_ra>
// kernel: tpu_custom_call.1
= control target key start
LH: loop header
LB: loop body
LE: loop exit
PB: predicated region body
PF: predicated region fallthrough
CT: control target
= control target key end

     0   :  { %s1241_s0 = inlined_call_operand.hbm [shape: f32[8,8,32], index: 0, kind: input, shape index: {}]   ;;  %s1242_s1 = inlined_call_operand.hbm [shape: f32[8,8,32], index: 1, kind: input, shape index: {}]   ;;  %s1243_s2 = inlined_call_operand.hbm [shape: f32[8,8,32], index: 2, kind: input, shape index: {}]   ;;  %s1244_s3 = inlined_call_operand.hbm [shape: f32[8,8,32], index: 3, kind: output, shape index: {}]  }
   0x1   :  { %1250 = sst [smem:[#allocation18_spill]] %s1242_s1 }
   0x2   :  { %8 = vsyncpa [#allocation6], 0 }
   0x3   :  { %10 = vsyncpa [#allocation6 + $0x1], 0 }
   0x4   :  { %11 = vsyncpa [#allocation9], 0 }
   0x5   :  { %13 = vsyncpa [#allocation9 + $0x1], 0 }
   0x6   :  { %14 = vsyncpa [#allocation7], 0 }
   0x7   :  { %16 = vsyncpa [#allocation7 + $0x1], 0  ;;  %s967_s12 = smov 0   ;;  %s969_s13 = smov 0  }
   0x8   :  { %s971_s14 = smov 0   ;;  %s973_s15 = smov 0  }
   0x9   :  { %s975_s16 = smov 0   ;;  %s977_s17 = smov 0  }
   0xa LB: > { %1251 = sst [smem:[#allocation15_spill]] %s933_s16  ;;  %s998_s18 = sadd.s32 4294967295, %s937_s17   ;;  %s937_s17 = sphi %s977_s17, %s22_s17   ;;  %s933_s16 = sphi %s975_s16, %s1271_s16   ;;  %s929_s15 = sphi %s973_s15, %s1270_s15   ;;  %s925_s14 = sphi %s971_s14, %s1274_s14   ;;  %s921_s13 = sphi %s969_s13, %s1273_s13   ;;  %s917_s12 = sphi %s967_s12, %s1272_s12  }
   0xb   : > { %s642_s19 = sadd.s32 4294967294, %s937_s17   ;;  %s41_s20 = sadd.s32 1, %s933_s16 }
   0xc   : > { %s50_s21 = sadd.s32 1, %s925_s14  ;;  %p43_p0 = scmp.ge.s32.totalorder %s41_s20, 8 }
   0xd   : > { %p57_p1 = scmp.ne.s32.totalorder %s925_s14, %s921_s13  ;;  %p58_p2 = scmp.eq.s32.totalorder %s937_s17, 0 }
   0xe   : > { %p63_p3 = scmp.ne.s32.totalorder %s921_s13, %s917_s12  ;;  %s1276_s20 = smov (%p43_p0, %s41_s20), 0 }
   0xf   : > { %1252 = sst [smem:[#allocation16_spill]] %s1276_s20  ;;  %p1010_p4 = por %p58_p2, %p57_p1 }
  0x10   : > { %p64_p5 = scmp.eq.s32.totalorder %s998_s18, 0  ;;  %s45_s23 = ssub.s32 %s933_s16, %s1276_s20 }
  0x11   : > { %p145_p6 = scmp.eq.s32.totalorder %s998_s18, 7  ;;  %p48_p7 = scmp.eq.s32.totalorder %s45_s23, 0 }
  0x12   : > { %p1018_p8 = por %p64_p5, %p63_p3  ;;  %p151_p10 = scmp.eq.s32.totalorder %s642_s19, 7 }
  0x13   : > { %p1022_p9 = por %p145_p6, %p57_p1  ;;  %p699_p12 = scmp.lt.s32.totalorder %s937_s17, 8 }
  0x14   : > { %s1254_s24 = scalar_select %p1018_p8, 1, 0 }
  0x15   : > { %s1255_s25 = scalar_select %p1022_p9, 1, 0 }
  0x16   : > { %s1027_s26 = scalar_select %p48_p7, %s925_s14, %s50_s21  }
  0x17   : > { %p1029_p11 = por %p151_p10, %p63_p3  ;;  %s171_s28 = sand.u32 1, %s925_s14  }
  0x18   : > { %1256 = sst [smem:[#allocation17_spill]] %s1027_s26  ;;  %s1037_s29 = sshll.u32 %s171_s28, 3 }
  0x19   : > { %s1257_s27 = scalar_select %p1029_p11, 1, 0 }
  0x1a   : > { %s1040_s30 = sshll.u32 %s933_s16, 7  ;;  %p1044_p13 = pnand %p699_p12, %p1010_p4 }
  0x1b   : > { %s190_s5 = sand.u32 1, %s937_s17   ;;  %s1259_s1 = sld [smem:[#allocation18_spill]] }
  0x1c   : > { %s1258_s4 = scalar_select %p1044_p13, 1, 0 }
  0x1d   : > { %s194_s9 = scalar_lea.vmem [#allocation8], %s1037_s29  ;;  %s1060_s11 = scalar_lea.sflag [#allocation9], %s190_s5 }
  0x1e   : > { %s202_s10 = sshll.u32 %s194_s9, 4  ;;  %p1066_p3 = pneg %p1044_p13  ;;  %s1057_s10 = int_to_ptr.vmem [resolvable:$true] %s202_s10 }
  0x21   : > { %s1053_s8 = scalar_lea.hbm %s1259_s1, %s1040_s30  ;;  %s766_s6 = scalar_lea.hbm %s1259_s1, 1024 }
  0x22   : > { %s761_s19 = scalar_lea.hbm %s1053_s8, 128  ;;  %p767_p6 = scmp.lt.u32.totalorder %s1053_s8, %s1259_s1 }
  0x23   : > { %p762_p2 = scmp.ne.s32.totalorder %s1053_s8, %s761_s19  ;;  %p768_p7 = scmp.lt.u32.totalorder %s766_s6, %s761_s19 }
  0x24   : > { %p770_p12 = scmp.lt.u32.totalorder %s761_s19, %s1053_s8 }
  0x25   : > { %p764_p4 = pnand %p1066_p3, %p762_p2  ;;  %p769_p10 = por %p768_p7, %p767_p6 }
  0x27   : > { %p765_p5 = pneg %p764_p4  ;;  %p771_p0 = por %p770_p12, %p769_p10 }
  0x29   : > { %p772_p1 = pnand %p771_p0, %p765_p5 }
  0x2b   : > { %775 = shalt.err (!%p772_p1)
}
  0x2c   : > { %s776_s5 = scalar_lea.vmem %s1057_s10, 128  ;;  %s939_s22 = smov [#allocation8]  }
  0x2d   : > { %p777_p2 = scmp.ne.s32.totalorder %s1057_s10, %s776_s5  ;;  %s781_s23 = sshll.u32 %s939_s22, 4  ;;  %s782_s23 = int_to_ptr.vmem [resolvable:$false] %s781_s23 }
  0x2e   : > { %s783_s7 = scalar_lea.vmem %s782_s23, 256  ;;  %p784_p9 = scmp.lt.s32.totalorder %s1057_s10, %s782_s23 }
  0x2f   : > { %p779_p4 = pnand %p777_p2, %p1066_p3  ;;  %p785_p8 = scmp.lt.s32.totalorder %s783_s7, %s776_s5 }
  0x31   : > { %p780_p11 = pneg %p779_p4  ;;  %p786_p6 = por %p785_p8, %p784_p9 }
  0x33   : > { %p787_p7 = pnand %p786_p6, %p780_p11 }
  0x35   : > { %790 = shalt.err (!%p787_p7)
}
  0x36   : > { %691 = dma.hbm_to_vmem [thread:$0]  (!%p1044_p13), %s1053_s8, 128, %s1057_s10, %s1060_s11  }
  0x37   : > { %p1261_p0 = scmp.lt.s32.totalorder %s937_s17, 9  ;;  %p1262_p1 = scmp.ge.s32.totalorder %s937_s17, 1 }
  0x38   : > { %s1102_s5 = scalar_lea.hbm %s1241_s0, %s1040_s30  ;;  %s175_s22 = scalar_lea.vmem [#allocation5], %s1037_s29 }
  0x39   : > { %p1094_p5 = pnand %p1262_p1, %p1261_p0  ;;  %s183_s23 = sshll.u32 %s175_s22, 4  ;;  %s1105_s23 = int_to_ptr.vmem [resolvable:$true] %s183_s23 }
  0x3a   : > { %s1111_s7 = scalar_lea.hbm %s1243_s2, %s1040_s30  ;;  %s172_s1 = scalar_lea.sflag [#allocation6], %s171_s28 }
  0x3b   : > { %s1263_s19 = scalar_select %p1094_p5, 1, 0 }
  0x3c   : > { %s791_s20 = scalar_lea.hbm %s1102_s5, 128  ;;  %s796_s16 = scalar_lea.hbm %s1241_s0, 1024 }
  0x3d   : > { %p792_p8 = scmp.ne.s32.totalorder %s1102_s5, %s791_s20  ;;  %p797_p10 = scmp.lt.u32.totalorder %s1102_s5, %s1241_s0 }
  0x3e   : > { %p798_p12 = scmp.lt.u32.totalorder %s796_s16, %s791_s20  ;;  %p800_p4 = scmp.lt.u32.totalorder %s791_s20, %s1102_s5 }
  0x3f   : > { %p794_p9 = pnand %p792_p8, %p1066_p3 }
  0x40   : > { %p799_p2 = por %p798_p12, %p797_p10 }
  0x41   : > { %p795_p11 = pneg %p794_p9 }
  0x42   : > { %p801_p6 = por %p800_p4, %p799_p2 }
  0x44   : > { %p802_p7 = pnand %p801_p6, %p795_p11 }
  0x46   : > { %805 = shalt.err (!%p802_p7)
}
  0x47   : > { %s806_s28 = scalar_lea.vmem %s1105_s23, 128  ;;  %s940_s30 = smov [#allocation5]  }
  0x48   : > { %p807_p0 = scmp.ne.s32.totalorder %s1105_s23, %s806_s28  ;;  %s811_s8 = sshll.u32 %s940_s30, 4  ;;  %s812_s8 = int_to_ptr.vmem [resolvable:$false] %s811_s8 }
  0x49   : > { %s813_s26 = scalar_lea.vmem %s812_s8, 256  ;;  %p814_p9 = scmp.lt.s32.totalorder %s1105_s23, %s812_s8 }
  0x4a   : > { %p809_p1 = pnand %p807_p0, %p1066_p3  ;;  %p815_p5 = scmp.lt.s32.totalorder %s813_s26, %s806_s28 }
  0x4c   : > { %p810_p8 = pneg %p809_p1  ;;  %p816_p10 = por %p815_p5, %p814_p9 }
  0x4e   : > { %p817_p12 = pnand %p816_p10, %p810_p8 }
  0x50   : > { %820 = shalt.err (!%p817_p12)
}
  0x51   : > { %688 = dma.hbm_to_vmem [thread:$0]  (!%p1044_p13), %s1102_s5, 128, %s1105_s23, %s172_s1  }
  0x52   : > { %s213_s16 = scalar_lea.vmem [#allocation10], %s1037_s29  ;;  %s821_s10 = scalar_lea.hbm %s1111_s7, 128 }
  0x53   : > { %s221_s20 = sshll.u32 %s213_s16, 4  ;;  %p822_p11 = scmp.ne.s32.totalorder %s1111_s7, %s821_s10  ;;  %s222_s20 = int_to_ptr.vmem [resolvable:$true] %s221_s20 }
  0x54   : > { %s826_s22 = scalar_lea.hbm %s1243_s2, 1024  ;;  %p827_p4 = scmp.lt.u32.totalorder %s1111_s7, %s1243_s2 }
  0x55   : > { %p824_p5 = pnand %p822_p11, %p1066_p3  ;;  %p828_p6 = scmp.lt.u32.totalorder %s826_s22, %s821_s10 }
  0x56   : > { %p830_p0 = scmp.lt.u32.totalorder %s821_s10, %s1111_s7 }
  0x57   : > { %p825_p2 = pneg %p824_p5  ;;  %p829_p7 = por %p828_p6, %p827_p4 }
  0x59   : > { %p831_p1 = por %p830_p0, %p829_p7 }
  0x5b   : > { %p832_p8 = pnand %p831_p1, %p825_p2 }
  0x5d   : > { %835 = shalt.err (!%p832_p8)
}
  0x5e   : > { %s836_s1 = scalar_lea.vmem %s222_s20, 128  ;;  %s941_s29 = smov [#allocation10]  }
  0x5f   : > { %p837_p9 = scmp.ne.s32.totalorder %s222_s20, %s836_s1  ;;  %s841_s5 = sshll.u32 %s941_s29, 4  ;;  %s842_s5 = int_to_ptr.vmem [resolvable:$false] %s841_s5 }
  0x60   : > { %s843_s23 = scalar_lea.vmem %s842_s5, 256  ;;  %p844_p11 = scmp.lt.s32.totalorder %s222_s20, %s842_s5 }
  0x61   : > { %p839_p10 = pnand %p837_p9, %p1066_p3  ;;  %p845_p5 = scmp.lt.s32.totalorder %s843_s23, %s836_s1 }
  0x63   : > { %p840_p12 = pneg %p839_p10  ;;  %p846_p13 = por %p845_p5, %p844_p11 }
  0x65   : > { %p847_p4 = pnand %p846_p13, %p840_p12 }
  0x67   : > { %850 = shalt.err (!%p847_p4)
}
  0x68   : > { %p1264_p6 = scmp.ne.s32.totalorder %s1258_s4, 0  ;;  %p1265_p2 = scmp.ne.s32.totalorder %s1263_s19, 0 }
  0x69   : > { %s1158_s21 = sand.u32 (!%p1265_p2), 1, %s921_s13   ;;  %p1266_p13 = scmp.ne.s32.totalorder (!%p1265_p2), %s1254_s24, 0 }
  0x6a   : > { %694 = dma.hbm_to_vmem [thread:$0]  (!%p1264_p6), %s1111_s7, 128, %s222_s20, %s1060_s11  }
  0x6b   : > { %230 = sbr.rel (%p1265_p2) target bundleno = 932 (0x3a4), region = 32  ;;  %s1161_s8 = sshll.u32 (!%p1265_p2), %s1158_s21, 3 }
  0x6c   : > { %s233_s26 = scalar_lea.sflag (!%p1265_p2), [#allocation6], %s1158_s21  ;;  %s236_s16 = scalar_lea.vmem (!%p1265_p2), [#allocation5], %s1161_s8 }
  0x72   : > { %904 = dma.done.wait (%p1266_p13), %s233_s26, 128  }
  0x73   : > { %906 = vsyncadd (%p1266_p13), %s233_s26, 4294967168  ;;  %s241_s4 = sand.u32 1, %s998_s18   ;;  %s245_s19 = scalar_lea.vmem [#allocation8], %s1161_s8 }
  0x74   : > { %s242_s11 = scalar_lea.sflag [#allocation9], %s241_s4 }
  0x75   : > { %908 = dma.done.wait (%p1266_p13), %s242_s11, 256  }
  0x76   : > { %910 = vsyncadd (%p1266_p13), %s242_s11, 4294967040  ;;  %vm294_vm0 = vcmask 261120   ;;  %v942_v0 = vmov 0.0   ;;  %vm943_vm1 = vmmov 0   ;;  %v298_v1 = vld [vmem:[%s245_s19] sm:$0xff]  ;;  %v296_v2 = vld [vmem:[%s236_s16] sm:$0xff] }
  0x77   : > { %667 = vmatprep.subr.mxu0 %v942_v0  ;;  %295 = vst.msk [vmem:[#allocation4] sm:$0xff] %vm294_vm0, %v942_v0  ;;  %669 = vmatprep.mubr.msk.f32.mxu0 %vm943_vm1, %v942_v0  ;;  %v297_v3 = vmul.f32 0.17677669, %v296_v2  ;;  %vm291_vm2 = vcmask 7168   ;;  %v944_v4 = vmov -inf   ;;  %vm378_vm3 = vcmask 64512  }
  0x78   : > { %672 = vmatprep.subr.mxu1 %v942_v0  ;;  %674 = vmatprep.mubr.msk.f32.mxu1 %vm943_vm1, %v942_v0  ;;  %292 = vst.msk [vmem:[#allocation2] sm:$0xff] %vm291_vm2, %v944_v4  ;;  %293 = vst.msk [vmem:[#allocation3] sm:$0xff] %vm291_vm2, %v942_v0  ;;  %v945_v8 = vmov 0   ;;  %s254_s18 = scalar_lea.vmem [#allocation10], %s1161_s8  ;;  %s660_s24 = sshll.u32 %s929_s15, 7 }
  0x79   : > { %668 = vmatpush3.xpose.msk.msra.mxu0 %vm294_vm0, %v298_v1  ;;  %753 = vset.pattern.permute.xlu0 %v945_v8  ;;  %v299_v13 = vld [vmem:[%s254_s18] sm:$0xff]  ;;  %s286_s7 = scalar_lea.vmem [#allocation11], %s1161_s8  ;;  %s1192_s9 = scalar_lea.hbm %s1244_s3, %s660_s24 }
  0x7a   : > { %754 = vset.pattern.permute.xlu1 %v945_v8  ;;  %673 = vmatpush3.msra.mxu1 %v299_v13  ;;  %s513_s20 = sshll.u32 %s286_s7, 4  ;;  %s499_s22 = scalar_lea.sflag [#allocation7], %s1158_s21  ;;  %s1194_s20 = int_to_ptr.vmem [resolvable:$true] %s513_s20 }
  0x7b   : > { %s851_s28 = scalar_lea.vmem %s1194_s20, 128  ;;  %p1267_p7 = scmp.ne.s32.totalorder %s1255_s25, 0 }
  0x7c   : > { %670 = vmatmul.mubr.msk.f32.vlgmr.msra.gmra.mrb[0].mxu0 %vm294_vm0, %v297_v3  ;;  %p852_p3 = scmp.ne.s32.totalorder %s1194_s20, %s851_s28  ;;  %s946_s15 = smov [#allocation11]  }
  0x7d   : > { %s855_s30 = sshll.u32 %s946_s15, 4  ;;  %s856_s30 = int_to_ptr.vmem [resolvable:$false] %s855_s30 }
  0x7e   : > { %v402_v26 = vld [vmem:[#allocation4] sm:$0xff]  ;;  %p853_p0 = pnand %p852_p3, %p1267_p7  ;;  %s857_s1 = scalar_lea.vmem %s856_s30, 256 }
  0x7f   : > { %v377_v9 = vld [vmem:[#allocation2] sm:$0xff]  ;;  %v394_v21 = vld [vmem:[#allocation3] sm:$0xff]  ;;  %p858_p8 = scmp.lt.s32.totalorder %s1194_s20, %s856_s30  ;;  %p859_p9 = scmp.lt.s32.totalorder %s857_s1, %s851_s28 }
  0x80   : > { %p854_p1 = pneg %p853_p0 }
  0x81   : > { %p860_p10 = por %p859_p9, %p858_p8 }
  0x83   : > { %p861_p12 = pnand %p860_p10, %p854_p1 }
 0x14f   : > { %v373_v5 = vpop.f32.mrb[0].mxu0 }
 0x150   : > { %v671_v6 = vpop.f32.mrb[1].mxu0  ;;  %v379_v7 = vsel %vm378_vm3, %v373_v5, -inf }
 0x151   : > { %380 = vmax.xlane.f32.xlu0 %v379_v7 }
 0x1de   : > { %v381_v10 = vpop.xlane.xlu0 %380 }
 0x1df   : > { %v382_v11 = vmax.f32 %v377_v9, %v381_v10 }
 0x1e1   : > { %v383_v12 = vsub.f32 %v377_v9, %v382_v11  ;;  %484 = vst.msk [vmem:[#allocation2] sm:$0xff] %vm291_vm2, %v382_v11  ;;  %388 = vperm.xlu0 %753, %v382_v11  }
 0x1e3   : > { %v384_v19 = vmul.f32 1.442695, %v383_v12 }
 0x260   : > { %v389_v14 = vpop.permute.xlu0 %388 }
 0x261   : > { %v391_v15 = vsub.f32 %v373_v5, %v389_v14 }
 0x263   : > { %v392_v16 = vmul.f32 1.442695, %v391_v15 }
 0x265   : > { %755 = vpow2.f32 %v392_v16 }
 0x266   : > { %757 = vpow2.f32 %v384_v19 }
 0x26f   : > { %v756_v17 = vpop.eup %755 }
 0x270   : > { %675 = vmatmul.mubr.msk.f32.vlgmr.msra.gmra.mrb[0].mxu1 %vm378_vm3, %v756_v17  ;;  %v396_v18 = vsel %vm378_vm3, %v756_v17, 0.0  ;;  %v758_v20 = vpop.eup %757 }
 0x271   : > { %397 = vadd.xlane.f32.xlu1 %v396_v18  ;;  %v395_v22 = vmul.f32 %v758_v20, %v394_v21 }
 0x282   : > { %405 = vperm.xlu1 %754, %v758_v20  }
 0x2fe   : > { %v398_v23 = vpop.xlane.xlu1 %397 }
 0x2ff   : > { %v399_v24 = vadd.f32 %v398_v23, %v395_v22 }
 0x301   : > { %401 = vst.msk [vmem:[#allocation3] sm:$0xff] %vm291_vm2, %v399_v24 }
 0x302   : > { %v406_v27 = vpop.permute.xlu1 %405 }
 0x303   : > { %v408_v28 = vmul.f32 %v406_v27, %v402_v26 }
 0x308   : > { %v489_v25 = vld [vmem:[#allocation3] sm:$0xff] }
 0x309   : > { %492 = vperm.xlu1 %754, %v489_v25  }
 0x343   : > { %v478_v29 = vpop.f32.mrb[0].mxu1 }
 0x344   : > { %v482_v30 = vadd.f32 %v478_v29, %v408_v28  ;;  %v676_v31 = vpop.f32.mrb[1].mxu1 }
 0x346   : > { %483 = vst.msk [vmem:[#allocation4] sm:$0xff] %vm294_vm0, %v482_v30 }
 0x34d   : > { %v488_v34 = vld [vmem:[#allocation4] sm:$0xff] }
 0x388   : > { %v493_v32 = vpop.permute.xlu1 %492 }
 0x389   : > { %759 = vrcp.f32 %v493_v32 }
 0x393   : > { %v760_v33 = vpop.eup %759 }
 0x394   : > { %v496_v35 = vmul.f32 %v760_v33, %v488_v34 }
 0x396   : > { %497 = vst.msk [vmem:[%s286_s7] sm:$0xff] %vm294_vm0, %v496_v35 }
 0x397   : > { %864 = shalt.err (!%p861_p12)
}
 0x398   : > { %s865_s29 = scalar_lea.hbm %s1192_s9, 128  ;;  %s869_s21 = scalar_lea.hbm %s1244_s3, 1024 }
 0x399   : > { %p866_p11 = scmp.ne.s32.totalorder %s1192_s9, %s865_s29  ;;  %p870_p6 = scmp.lt.u32.totalorder %s1192_s9, %s1244_s3 }
 0x39a   : > { %p871_p2 = scmp.lt.u32.totalorder %s869_s21, %s865_s29  ;;  %p873_p3 = scmp.lt.u32.totalorder %s865_s29, %s1192_s9 }
 0x39b   : > { %p867_p5 = pnand %p866_p11, %p1267_p7 }
 0x39c   : > { %p872_p13 = por %p871_p2, %p870_p6 }
 0x39d   : > { %p868_p4 = pneg %p867_p5 }
 0x39e   : > { %p874_p0 = por %p873_p3, %p872_p13 }
 0x3a0   : > { %p875_p1 = pnand %p874_p0, %p868_p4 }
 0x3a2   : > { %878 = shalt.err (!%p875_p1)
}
 0x3a3   : > { %683 = dma.vmem_to_hbm [thread:$0]  (%p1267_p7), %s1194_s20, 128, %s1192_s9, %s499_s22  }
 0x3a4 PF: > { %p700_p8 = scmp.ge.s32.totalorder %s937_s17, 2  ;;  %s525_s16 = sand.u32 1, %s917_s12  }
 0x3a5   : > { %p1268_p9 = scmp.ne.s32.totalorder %s1257_s27, 0  ;;  %s526_s4 = scalar_lea.sflag [#allocation7], %s525_s16 }
 0x3a7   : > { %p696_p10 = pnand %p700_p8, %p1268_p9 }
 0x3a9   : > { %912 = dma.done.wait (!%p696_p10), %s526_s4, 128  }
 0x3aa   : > { %914 = vsyncadd (!%p696_p10), %s526_s4, 4294967168  ;;  %s22_s17 = sadd.s32 1, %s937_s17   ;;  %s1269_s25 = sld [smem:[#allocation17_spill]] }
 0x3ab   : > { %p19_p12 = scmp.ge.s32.totalorder %s22_s17, 10   ;;  %s1270_s15 = sld [smem:[#allocation15_spill]] }
 0x3ac   : > { %s1271_s16 = sld [smem:[#allocation16_spill]]  ;;  %s1272_s12 = smov %s921_s13 }
 0x3ad   : > { %s1273_s13 = smov %s925_s14  ;;  %21 = sbr.rel (!%p19_p12) target bundleno = 10 (0xa), region = 109 }
 0x3b0   : > { %s1274_s14 = smov %s1269_s25 }
 0x3b4   :  { %531 = vsyncpa [#allocation6], 1 }
 0x3b5   :  { %533 = vsyncpa [#allocation6 + $0x1], 1 }
 0x3b6   :  { %534 = vsyncpa [#allocation9], 1 }
 0x3b7   :  { %536 = vsyncpa [#allocation9 + $0x1], 1 }
 0x3b8   :  { %537 = vsyncpa [#allocation7], 1 }
 0x3b9   :  { %539 = vsyncpa [#allocation7 + $0x1], 1 }

</bundles_post_ra>
